<compile_context>
chip_gen: v6e
topology: v6e:2x2x1
jax: 0.10.0
libtpu: 0.0.40
codegen_flags: <defaults>
</compile_context>

<pallas_src>
import functools

import jax
import jax.numpy as jnp
from jax import lax
from jax.experimental import pallas as pl
from jax.experimental.pallas import tpu as pltpu


def merge_nn_kernel(x_ref, w1_ref, b1_ref, w2t_ref, b2_ref, o_ref):
    # Cast x to bf16 in-kernel (VPU has slack) rather than pre-materializing a
    # bf16 copy of x in HBM.
    x_bf16 = x_ref[...].astype(jnp.bfloat16)
    # fc1: (TILE_B, F) @ (F, H) on the MXU, f32 accumulation; bias + ReLU on VPU.
    h = jnp.dot(x_bf16, w1_ref[...], preferred_element_type=jnp.float32)
    h = jnp.maximum(h + b1_ref[...], 0.0)
    # fc2, lane-dense: contract the hidden dim of w2^T (1, H) against h
    # (TILE_B, H)  ->  (1, TILE_B), so the store is a full-lane vst.
    # bf16 operands keep the M=1 matmul off the f32 multi-pass emulation path.
    z = lax.dot_general(
        w2t_ref[...], h.astype(jnp.bfloat16),
        dimension_numbers=(((1,), (1,)), ((), ())),
        preferred_element_type=jnp.float32,
    )
    z = z + b2_ref[0, 0]                       # scalar bias from SMEM
    o_ref[0] = jax.nn.sigmoid(z).astype(o_ref.dtype)


@functools.partial(jax.jit, static_argnames=("tile_b", "vmem_limit_bytes"))
def merge_nn_forward(x, w1, b1, w2, b2, *, tile_b=8192,
                     vmem_limit_bytes=32 * 1024 * 1024):
    """sigmoid(relu(x @ w1 + b1) @ w2 + b2)  ->  (B, 1) float32.

    x: (B, F); w1: (F, 64); b1: (1, 64) or (64,); w2: (64, 1); b2: (1, 1) or (1,).
    (Weights are stored transposed w.r.t. PyTorch's nn.Linear layout.)

    VMEM budget per tile ~= tile_b * (512 B h-intermediate + 2*F*4 B x double
    buffer) + small; tile_b <= 16384 fits the 32 MiB scoped default on all
    generations.  On v7x (64 MiB VMEM/TC) keep tile_b <= ~16-32K and
    vmem_limit_bytes <= ~48 MiB.
    """
    B, F = x.shape
    H = w1.shape[1]

    # --- tile selection --------------------------------------------------------
    H_pad = ((H + 127) // 128) * 128                      # full-lane hidden dim
    B8 = ((B + 7) // 8) * 8                               # sublane-rounded batch
    tile_b = max(8, min(int(tile_b), B8))                 # clamp tile for tiny B
    n_tiles = pl.cdiv(B8, tile_b)
    # Prefer >= 2 grid steps when the batch is big enough so the "parallel"
    # batch axis can use both TensorCores on v7x (extra step cost is ~0.35us).
    if n_tiles == 1 and B8 >= 2 * 1024:
        tile_b = ((pl.cdiv(B8, 2) + 7) // 8) * 8
        n_tiles = pl.cdiv(B8, tile_b)
    B_pad = n_tiles * tile_b

    # --- layout prep at the pallas_call boundary ------------------------------
    # x stays in its native dtype; pad batch only if it doesn't divide evenly.
    x_in = x if B_pad == B else jnp.pad(x, ((0, B_pad - B), (0, 0)))
    w1_p = jnp.pad(w1.astype(jnp.bfloat16), ((0, 0), (0, H_pad - H)))
    b1_p = jnp.pad(jnp.asarray(b1, jnp.float32).reshape(1, H),
                   ((0, 0), (0, H_pad - H)))
    w2t_p = jnp.pad(jnp.asarray(w2, jnp.bfloat16).reshape(1, H),
                    ((0, 0), (0, H_pad - H)))             # (1, H_pad) bf16
    b2_p = jnp.asarray(b2, jnp.float32).reshape(1, 1)

    cost = pl.CostEstimate(
        flops=2 * B_pad * F * H_pad + 2 * B_pad * H_pad,
        transcendentals=B_pad,                            # sigmoid -> exp
        bytes_accessed=(B_pad * F * x.dtype.itemsize      # real x read (f32)
                        + F * H_pad * 2                   # w1 (bf16, resident)
                        + H_pad * 4 + H_pad * 2 + 4       # b1, w2^T, b2
                        + B_pad * 4),                     # output
    )

    out = pl.pallas_call(
        merge_nn_kernel,
        out_shape=jax.ShapeDtypeStruct((n_tiles, 1, tile_b), jnp.float32),
        grid=(n_tiles,),
        in_specs=[
            pl.BlockSpec((tile_b, F), lambda i: (i, 0)),   # x tile (pipelined)
            pl.BlockSpec((F, H_pad), lambda i: (0, 0)),    # w1 (resident)
            pl.BlockSpec((1, H_pad), lambda i: (0, 0)),    # b1 (resident)
            pl.BlockSpec((1, H_pad), lambda i: (0, 0)),    # w2^T (resident)
            pl.BlockSpec(memory_space=pltpu.SMEM),         # b2 scalar in SMEM
        ],
        out_specs=pl.BlockSpec((1, 1, tile_b), lambda i: (i, 0, 0)),
        compiler_params=pltpu.CompilerParams(
            dimension_semantics=("parallel",),
            vmem_limit_bytes=vmem_limit_bytes,
        ),
        cost_estimate=cost,
    )(x_in, w1_p, b1_p, w2t_p, b2_p)

    # (n_tiles, 1, tile_b) is row-major over padded batch -> (B, 1).
    return out.reshape(B_pad, 1)[:B]


if __name__ == "__main__":
    key = jax.random.PRNGKey(0)
    kx, k1, k2, k3, k4 = jax.random.split(key, 5)

    batch = 8
    input_size = 32
    hidden = 64

    # Deterministic init mimicking nn.Linear's uniform(-1/sqrt(fan_in), ...).
    bound1 = 1.0 / jnp.sqrt(input_size)
    bound2 = 1.0 / jnp.sqrt(hidden)
    x = jax.random.normal(kx, (batch, input_size), jnp.float32)
    w1 = jax.random.uniform(k1, (input_size, hidden), jnp.float32, -bound1, bound1)
    b1 = jax.random.uniform(k2, (1, hidden), jnp.float32, -bound1, bound1)
    w2 = jax.random.uniform(k3, (hidden, 1), jnp.float32, -bound2, bound2)
    b2 = jax.random.uniform(k4, (1, 1), jnp.float32, -bound2, bound2)

    out = merge_nn_forward(x, w1, b1, w2, b2)
    out = jax.block_until_ready(out)

    # Reference in plain JAX (f32 everywhere); kernel uses bf16 matmul operands
    # so the tolerance is set for bf16 rounding of K=32 / K=128 contractions.
    ref = jax.nn.sigmoid(jnp.maximum(x @ w1 + b1, 0.0) @ w2 + b2)
    assert out.shape == (batch, 1)
    assert jnp.allclose(out, ref, atol=1e-2, rtol=0.0), float(
        jnp.max(jnp.abs(out - ref)))

    print("KERNEL_OK")
</pallas_src>

<mosaic_0001>
module attributes {stable_mosaic.version = 11 : i64} {
  func.func @merge_nn_kernel(%arg0: i32, %arg1: memref<8x32xf32, #tpu.memory_space<vmem>>, %arg2: memref<32x128xbf16, #tpu.memory_space<vmem>>, %arg3: memref<1x128xf32, #tpu.memory_space<vmem>>, %arg4: memref<1x128xbf16, #tpu.memory_space<vmem>>, %arg5: memref<1x1xf32, #tpu.memory_space<smem>>, %arg6: memref<1x1x8xf32, #tpu.memory_space<vmem>>) attributes {dimension_semantics = [#tpu.dimension_semantics<parallel>], iteration_bounds = array<i64: 1>, scalar_prefetch = 0 : i64, scratch_operands = 0 : i64, tpu.core_type = #tpu.core_type<tc>, window_params = [{transform_indices = @transform_0, window_bounds = array<i64: 8, 32>}, {pipeline_mode = #tpu.pipeline_mode<synchronous>, transform_indices = @transform_1, window_bounds = array<i64: 32, 128>}, {pipeline_mode = #tpu.pipeline_mode<synchronous>, transform_indices = @transform_2, window_bounds = array<i64: 1, 128>}, {pipeline_mode = #tpu.pipeline_mode<synchronous>, transform_indices = @transform_3, window_bounds = array<i64: 1, 128>}, {transform_indices = @transform_4, window_bounds = array<i64: 1, 1>}, {transform_indices = @transform_5, window_bounds = array<i64: 1, 1, 8>}]} {
    %c0 = arith.constant 0 : index
    %c0_0 = arith.constant 0 : index
    %0 = vector.load %arg1[%c0, %c0_0] : memref<8x32xf32, #tpu.memory_space<vmem>>, vector<8x32xf32>
    %1 = arith.truncf %0 : vector<8x32xf32> to vector<8x32xbf16>
    %c0_1 = arith.constant 0 : index
    %c0_2 = arith.constant 0 : index
    %2 = vector.load %arg2[%c0_1, %c0_2] : memref<32x128xbf16, #tpu.memory_space<vmem>>, vector<32x128xbf16>
    %cst = arith.constant dense<0.000000e+00> : vector<8x128xf32>
    %3 = tpu.matmul %1, %2, %cst {dimension_numbers = #tpu.dot_dimension_numbers<[1], [0], [0], [1], [0, 0, 1, 1], [], []>} : vector<8x32xbf16>, vector<32x128xbf16>, vector<8x128xf32> -> vector<8x128xf32>
    %c0_3 = arith.constant 0 : index
    %c0_4 = arith.constant 0 : index
    %4 = vector.load %arg3[%c0_3, %c0_4] : memref<1x128xf32, #tpu.memory_space<vmem>>, vector<1x128xf32>
    %5 = vector.broadcast %4 : vector<1x128xf32> to vector<8x128xf32>
    %6 = arith.addf %3, %5 : vector<8x128xf32>
    %cst_5 = arith.constant 0.000000e+00 : f32
    %7 = vector.broadcast %cst_5 : f32 to vector<8x128xf32>
    %8 = arith.maximumf %6, %7 : vector<8x128xf32>
    %c0_6 = arith.constant 0 : index
    %c0_7 = arith.constant 0 : index
    %9 = vector.load %arg4[%c0_6, %c0_7] : memref<1x128xbf16, #tpu.memory_space<vmem>>, vector<1x128xbf16>
    %10 = arith.truncf %8 : vector<8x128xf32> to vector<8x128xbf16>
    %cst_8 = arith.constant dense<0.000000e+00> : vector<1x8xf32>
    %11 = tpu.matmul %9, %10, %cst_8 {dimension_numbers = #tpu.dot_dimension_numbers<[1], [1], [0], [0], [0, 0, 1, 0], [], []>} : vector<1x128xbf16>, vector<8x128xbf16>, vector<1x8xf32> -> vector<1x8xf32>
    %c0_9 = arith.constant 0 : index
    %c0_10 = arith.constant 0 : index
    %12 = memref.load %arg5[%c0_9, %c0_10] : memref<1x1xf32, #tpu.memory_space<smem>>
    %13 = vector.broadcast %12 : f32 to vector<1x8xf32>
    %14 = arith.addf %11, %13 : vector<1x8xf32>
    %15 = arith.negf %14 : vector<1x8xf32>
    %16 = math.exp %15 : vector<1x8xf32>
    %cst_11 = arith.constant 1.000000e+00 : f32
    %17 = vector.broadcast %cst_11 : f32 to vector<1x8xf32>
    %18 = arith.addf %17, %16 : vector<1x8xf32>
    %19 = arith.divf %17, %18 : vector<1x8xf32>
    %c0_12 = arith.constant 0 : index
    %c0_13 = arith.constant 0 : index
    %c0_14 = arith.constant 0 : index
    %20 = vector.load %arg6[%c0_12, %c0_13, %c0_14] : memref<1x1x8xf32, #tpu.memory_space<vmem>>, vector<1x1x8xf32>
    %21 = vector.shape_cast %20 : vector<1x1x8xf32> to vector<1x8xf32>
    %22 = vector.shape_cast %19 : vector<1x8xf32> to vector<1x1x8xf32>
    tpu.vector_store %arg6[%c0_12, %c0_13, %c0_14], %22 {strides = array<i32>} : memref<1x1x8xf32, #tpu.memory_space<vmem>>, vector<1x1x8xf32>,
    return
  }
  func.func @transform_0(%arg0: i32) -> (i32, i32) {
    %c0_i32 = arith.constant 0 : i32
    %c0_i32_0 = arith.constant 0 : i32
    return %arg0, %c0_i32 : i32, i32
  }
  func.func @transform_1(%arg0: i32) -> (i32, i32) {
    %c0_i32 = arith.constant 0 : i32
    %c0_i32_0 = arith.constant 0 : i32
    %c0_i32_1 = arith.constant 0 : i32
    return %c0_i32, %c0_i32_0 : i32, i32
  }
  func.func @transform_2(%arg0: i32) -> (i32, i32) {
    %c0_i32 = arith.constant 0 : i32
    %c0_i32_0 = arith.constant 0 : i32
    %c0_i32_1 = arith.constant 0 : i32
    return %c0_i32, %c0_i32_0 : i32, i32
  }
  func.func @transform_3(%arg0: i32) -> (i32, i32) {
    %c0_i32 = arith.constant 0 : i32
    %c0_i32_0 = arith.constant 0 : i32
    %c0_i32_1 = arith.constant 0 : i32
    return %c0_i32, %c0_i32_0 : i32, i32
  }
  func.func @transform_4(%arg0: i32) -> (i32, i32) {
    %c0_i32 = arith.constant 0 : i32
    %c0_i32_0 = arith.constant 0 : i32
    %c0_i32_1 = arith.constant 0 : i32
    return %c0_i32, %c0_i32_0 : i32, i32
  }
  func.func @transform_5(%arg0: i32) -> (i32, i32, i32) {
    %c0_i32 = arith.constant 0 : i32
    %c0_i32_0 = arith.constant 0 : i32
    %c0_i32_1 = arith.constant 0 : i32
    return %arg0, %c0_i32, %c0_i32_0 : i32, i32, i32
  }
}

</mosaic_0001>

<bundles_post_ra>
// kernel: merge_nn_forward.1
= control target key start
LH: loop header
LB: loop body
LE: loop exit
PB: predicated region body
PF: predicated region fallthrough
CT: control target
= control target key end

     0   :  { %v214_v1 = vmov 0.0   ;;  %vm215_vm0 = vmmov 0   ;;  %s268_s0 = inlined_call_operand.vmem [shape: f32[8,32], index: 0, kind: input, shape index: {}]   ;;  %s269_s1 = inlined_call_operand.vmem [shape: bf16[32,128], index: 1, kind: input, shape index: {}]   ;;  %s270_s2 = inlined_call_operand.vmem [shape: f32[1,128], index: 2, kind: input, shape index: {}]   ;;  %s271_s3 = inlined_call_operand.vmem [shape: bf16[1,128], index: 3, kind: input, shape index: {}]   ;;  %s272_s4 = inlined_call_operand.<no memory space> [shape: f32[1,1], index: 4, kind: input, shape index: {}]   ;;  %s273_s5 = inlined_call_operand.hbm [shape: f32[1,1,8], index: 5, kind: output, shape index: {}]  }
   0x1   :  { %v186_v0 = vld [vmem:[%s269_s1 + $0x8] sm:$0xff]   ;;  %169 = vmatprep.subr.bf16.mxu0 %v214_v1  ;;  %177 = vmatprep.subr.bf16.mxu1 %v214_v1  ;;  %v187_v2 = vld [vmem:[%s269_s1] sm:$0xff]  }
   0x2   :  { %170 = vmatpush3.bf16.msra.mxu0 %v186_v0  ;;  %173 = vmatprep.mubr.msk.bf16.mxu0 %vm215_vm0, %v214_v1  ;;  %v23_v3 = vld [vmem:[%s268_s0] sm:$0xff] }
   0x3   :  { %11 = vsyncpa [#allocation4], 0  ;;  %171 = vmatprep.subr.bf16.mxu0 %v214_v1  ;;  %179 = vmatprep.mubr.msk.bf16.mxu1 %vm215_vm0, %v214_v1  ;;  %v24_v4 = vpack.c.bf16 %v23_v3, %v23_v3  ;;  %vm48_vm1 = vcmask 261120   ;;  %v159_v5 = vld [vmem:[%s270_s2] ss:$0 sm:$0xff]  ;;  %v96_v14 = vstv %s272_s4  ;;  %s216_s2 = smov [#allocation3]  }
   0x4   :  { %v93_v13 = vld [vmem:[%s271_s3] sm:$0x1]  ;;  %s151_s28 = sshll.u32 %s216_s2, 4  ;;  %vm143_vm2 = vcmask 57344   ;;  %s152_s28 = int_to_ptr.vmem [resolvable:$true] %s151_s28 }
   0x5   :  { %s192_s3 = scalar_lea.vmem %s152_s28, 16  ;;  %s196_s29 = scalar_lea.vmem %s152_s28, 32 }
   0x6   :  { %172 = vmatpush3.bf16.msra.mxu0 %v187_v2  ;;  %p193_p0 = scmp.ne.s32.totalorder %s152_s28, %s192_s3  ;;  %p197_p1 = scmp.lt.s32.totalorder %s152_s28, %s152_s28 }
   0x7   :  { %p198_p2 = scmp.lt.s32.totalorder %s196_s29, %s192_s3 }
   0x9   :  { %174 = vmatmul.mubr.msk.bf16.vlgmr.msra.gmra.mxu0 %vm48_vm1, %v24_v4  ;;  %p199_p3 = por %p198_p2, %p197_p1 }
   0xb   :  { %p200_p4 = pnand %p199_p3, %p193_p0 }
  0xc9   :  { %v86_v6 = vpop.f32.mrf.mxu0 }
  0xca   :  { %v87_v7 = vadd.f32 %v159_v5, %v86_v6 }
  0xcb   :  { %v175_v8 = vpop.f32.mrf.mxu0 }
  0xcc   :  { %v92_v9 = vmax.f32 %v87_v7, 0.0 }
  0xcd   :  { %v89_v10 = vpop.f32.mrf.mxu0 }
  0xce   :  { %v94_v11 = vpack.c.bf16 %v92_v9, %v92_v9 }
  0xcf   :  { %v176_v12 = vpop.f32.mrf.mxu0 }
  0xd0   :  { %178 = vmatpush3.bf16.xpose.msra.mxu1 %v94_v11 }
  0xd7   :  { %180 = vmatmul.mubr.bf16.vlgmr.msra.gmra.mxu1 %v93_v13 }
 0x197   :  { %v131_v15 = vpop.f32.mrf.mxu1 }
 0x198   :  { %v132_v16 = vadd.f32 %v131_v15, %v96_v14 }
 0x199   :  { %v181_v17 = vpop.f32.mrf.mxu1 }
 0x19a   :  { %v163_v18 = vmul.f32 -1.442695, %v132_v16 }
 0x19b   :  { %v134_v19 = vpop.f32.mrf.mxu1 }
 0x19c   :  { %188 = vpow2.f32 %v163_v18 }
 0x19d   :  { %v182_v20 = vpop.f32.mrf.mxu1 }
 0x1a9   :  { %v189_v21 = vpop.eup %188 }
 0x1aa   :  { %v140_v22 = vadd.f32 1.0, %v189_v21 }
 0x1ac   :  { %190 = vrcp.f32 %v140_v22 }
 0x1b9   :  { %v191_v23 = vpop.eup %190 }
 0x1ba   :  { %144 = vst.msk [vmem:[#allocation3] sm:$0x1] %vm143_vm2, %v191_v23 }
 0x1bb   :  { %203 = shalt.err (!%p200_p4)
}
 0x1bc   :  { %154 = dma.vmem_to_hbm [thread:$0]  %s152_s28, 16, %s273_s5, [#allocation4]  }
 0x1bd   :  { %212 = dma.done.wait [#allocation4], 16  }
 0x1be   :  { %213 = vsyncadd [#allocation4], 4294967280 }
 0x1bf   :  { %158 = vsyncpa [#allocation4], 1 }

</bundles_post_ra>
